<compile_context>
chip_gen: v5e
topology: v5e:2x2
jax: 0.10.0
libtpu: 0.0.40
codegen_flags: <defaults>
</compile_context>

<pallas_src>
import math

import jax
import jax.numpy as jnp
from jax.experimental import pallas as pl
from jax.experimental.pallas import tpu as pltpu


def _mlp_kernel(x_ref, w1_ref, b1_ref, w2_ref, b2_ref, w3_ref, b3_ref,
                out_ref, h1_ref, h2_ref):
    # Layer 1: Linear + ReLU (dropout == identity in eval)
    h1 = jnp.dot(x_ref[...], w1_ref[...], preferred_element_type=jnp.float32)
    h1 = jnp.maximum(h1 + b1_ref[...], 0.0)
    h1_ref[...] = h1.astype(h1_ref.dtype)

    # Layer 2: Linear + ReLU (dropout == identity in eval)
    h2 = jnp.dot(h1.astype(w2_ref.dtype), w2_ref[...],
                 preferred_element_type=jnp.float32)
    h2 = jnp.maximum(h2 + b2_ref[...], 0.0)
    h2_ref[...] = h2.astype(h2_ref.dtype)

    # Layer 3: Linear (no activation)
    out = jnp.dot(h2.astype(w3_ref.dtype), w3_ref[...],
                  preferred_element_type=jnp.float32)
    out_ref[...] = (out + b3_ref[...]).astype(out_ref.dtype)


def _round_up(n, m):
    return ((n + m - 1) // m) * m


def _pad2(a, rows, cols):
    return jnp.pad(a, ((0, rows - a.shape[0]), (0, cols - a.shape[1])))


def linear_decoder_forward(x, params, *, batch_tile=256, use_bf16=True):
    """x: [B, input_dim] float32. params: dict of weights/biases (W as [in, out]).
    Returns (final_output, [h1, h2]) matching the PyTorch module (f32)."""
    w1, b1 = params["w1"], params["b1"]
    w2, b2 = params["w2"], params["b2"]
    w3, b3 = params["w3"], params["b3"]

    B, K = x.shape
    H1, H2, D = w1.shape[1], w2.shape[1], w3.shape[1]

    # Lane-dense padding (multiples of 128) for every matmul/store dimension.
    Kp, H1p, H2p, Dp = (_round_up(d, 128) for d in (K, H1, H2, D))

    # Batch tile: multiple of 8 (f32 sublane), no larger than the padded batch.
    TB = min(batch_tile, _round_up(B, 8))
    Bp = _round_up(B, TB)
    num_tiles = pl.cdiv(Bp, TB)

    op_dtype = jnp.bfloat16 if use_bf16 else x.dtype

    # Zero-pad: padded input cols / weight rows contribute exactly 0, padded
    # output cols get bias 0 and ReLU(0)=0, so the valid region is unchanged.
    xp = _pad2(x, Bp, Kp).astype(op_dtype)
    w1p = _pad2(w1, Kp, H1p).astype(op_dtype)
    w2p = _pad2(w2, H1p, H2p).astype(op_dtype)
    w3p = _pad2(w3, H2p, Dp).astype(op_dtype)
    b1p = _pad2(b1, 1, H1p).astype(jnp.float32)
    b2p = _pad2(b2, 1, H2p).astype(jnp.float32)
    b3p = _pad2(b3, 1, Dp).astype(jnp.float32)

    # Rough VMEM budget (weights + biases double-buffer-conservative, plus
    # double-buffered activation/output tiles).
    itm = jnp.dtype(op_dtype).itemsize
    w_bytes = (Kp * H1p + H1p * H2p + H2p * Dp) * itm + (H1p + H2p + Dp) * 4
    act_bytes = 2 * TB * (Kp * itm + (H1p + H2p + Dp) * 4)
    vmem_est = 2 * w_bytes + act_bytes

    cp_kwargs = dict(dimension_semantics=("parallel",))
    if vmem_est > 16 * 1024 * 1024:
        # Keep the cap at 64 MiB so it stays legal on v7x (64 MiB physical VMEM).
        cp_kwargs["vmem_limit_bytes"] = min(vmem_est + (4 << 20), 64 * 1024 * 1024)
    compiler_params = pltpu.CompilerParams(**cp_kwargs)

    batch_spec = lambda n: pl.BlockSpec((TB, n), lambda i: (i, 0))
    resident = lambda shape: pl.BlockSpec(shape, lambda i: (0, 0))

    out_p, h1_p, h2_p = pl.pallas_call(
        _mlp_kernel,
        grid=(num_tiles,),
        in_specs=[
            batch_spec(Kp),
            resident(w1p.shape), resident(b1p.shape),
            resident(w2p.shape), resident(b2p.shape),
            resident(w3p.shape), resident(b3p.shape),
        ],
        out_specs=(
            batch_spec(Dp),
            batch_spec(H1p),
            batch_spec(H2p),
        ),
        out_shape=(
            jax.ShapeDtypeStruct((Bp, Dp), jnp.float32),
            jax.ShapeDtypeStruct((Bp, H1p), jnp.float32),
            jax.ShapeDtypeStruct((Bp, H2p), jnp.float32),
        ),
        compiler_params=compiler_params,
    )(xp, w1p, b1p, w2p, b2p, w3p, b3p)

    out = out_p[:B, :D]
    h1 = h1_p[:B, :H1]
    h2 = h2_p[:B, :H2]
    return out, [h1, h2]


def init_params(key, input_dim, hidden_dim_1, hidden_dim_2, output_dim):
    """Deterministic parameter init mirroring the PyTorch module:
    - kaiming_normal_ nonlinearity='relu'   -> std = sqrt(2 / fan_in)
    - kaiming_normal_ nonlinearity='linear' -> std = sqrt(1 / fan_in)
    - nn.Linear default bias: U(-1/sqrt(fan_in), 1/sqrt(fan_in))
    Weights are stored as [in, out] (transpose of PyTorch [out, in])."""
    ks = jax.random.split(key, 6)

    def kaiming(k, fan_in, fan_out, gain):
        std = gain / jnp.sqrt(fan_in)
        return jax.random.normal(k, (fan_in, fan_out), jnp.float32) * std

    def bias(k, fan_in, fan_out):
        bound = 1.0 / jnp.sqrt(fan_in)
        # keep biases 2D [1, out] for clean lane-broadcast inside the kernel
        return jax.random.uniform(k, (1, fan_out), jnp.float32, -bound, bound)

    w1 = kaiming(ks[0], input_dim, hidden_dim_1, jnp.sqrt(2.0))
    b1 = bias(ks[1], input_dim, hidden_dim_1)
    w2 = kaiming(ks[2], hidden_dim_1, hidden_dim_2, jnp.sqrt(2.0))
    b2 = bias(ks[3], hidden_dim_1, hidden_dim_2)
    w3 = kaiming(ks[4], hidden_dim_2, output_dim, 1.0)
    b3 = bias(ks[5], hidden_dim_2, output_dim)
    return {"w1": w1, "b1": b1, "w2": w2, "b2": b2, "w3": w3, "b3": b3}


def reference_forward(x, params):
    h1 = jnp.maximum(x @ params["w1"] + params["b1"], 0.0)
    h2 = jnp.maximum(h1 @ params["w2"] + params["b2"], 0.0)
    out = h2 @ params["w3"] + params["b3"]
    return out, [h1, h2]


if __name__ == "__main__":
    # Small shapes consistent with the module's forward.
    batch, input_dim, hidden_dim_1, hidden_dim_2, output_dim = 8, 32, 64, 48, 16

    key = jax.random.PRNGKey(0)
    k_x, k_p = jax.random.split(key)
    x = jax.random.normal(k_x, (batch, input_dim), jnp.float32)
    params = init_params(k_p, input_dim, hidden_dim_1, hidden_dim_2, output_dim)

    ref_out, ref_inters = reference_forward(x, params)

    # 1) f32-operand path: must match the reference tightly (validates the
    #    padding / tiling plumbing independent of bf16 rounding).
    out_f32, inters_f32 = linear_decoder_forward(x, params, use_bf16=False)
    out_f32 = jax.block_until_ready(out_f32)
    inters_f32 = [jax.block_until_ready(h) for h in inters_f32]
    assert jnp.allclose(out_f32, ref_out, atol=1e-5, rtol=1e-5)
    for h, rh in zip(inters_f32, ref_inters):
        assert jnp.allclose(h, rh, atol=1e-5, rtol=1e-5)

    # 2) bf16-operand path (default, MXU-friendly): f32 accumulation, looser
    #    tolerance due to operand rounding.
    out, inters = linear_decoder_forward(x, params, use_bf16=True)
    out = jax.block_until_ready(out)
    inters = [jax.block_until_ready(h) for h in inters]
    assert jnp.allclose(out, ref_out, atol=5e-2, rtol=5e-2)
    for h, rh in zip(inters, ref_inters):
        assert jnp.allclose(h, rh, atol=5e-2, rtol=5e-2)

    print("KERNEL_OK")
</pallas_src>

<mosaic_0001>
module attributes {stable_mosaic.version = 11 : i64} {
  func.func @_mlp_kernel(%arg0: i32, %arg1: memref<8x128xf32, #tpu.memory_space<vmem>>, %arg2: memref<128x128xf32, #tpu.memory_space<vmem>>, %arg3: memref<1x128xf32, #tpu.memory_space<vmem>>, %arg4: memref<128x128xf32, #tpu.memory_space<vmem>>, %arg5: memref<1x128xf32, #tpu.memory_space<vmem>>, %arg6: memref<128x128xf32, #tpu.memory_space<vmem>>, %arg7: memref<1x128xf32, #tpu.memory_space<vmem>>, %arg8: memref<8x128xf32, #tpu.memory_space<vmem>>, %arg9: memref<8x128xf32, #tpu.memory_space<vmem>>, %arg10: memref<8x128xf32, #tpu.memory_space<vmem>>) attributes {dimension_semantics = [#tpu.dimension_semantics<parallel>], iteration_bounds = array<i64: 1>, scalar_prefetch = 0 : i64, scratch_operands = 0 : i64, tpu.core_type = #tpu.core_type<tc>, window_params = [{transform_indices = @transform_0, window_bounds = array<i64: 8, 128>}, {pipeline_mode = #tpu.pipeline_mode<synchronous>, transform_indices = @transform_1, window_bounds = array<i64: 128, 128>}, {pipeline_mode = #tpu.pipeline_mode<synchronous>, transform_indices = @transform_2, window_bounds = array<i64: 1, 128>}, {pipeline_mode = #tpu.pipeline_mode<synchronous>, transform_indices = @transform_3, window_bounds = array<i64: 128, 128>}, {pipeline_mode = #tpu.pipeline_mode<synchronous>, transform_indices = @transform_4, window_bounds = array<i64: 1, 128>}, {pipeline_mode = #tpu.pipeline_mode<synchronous>, transform_indices = @transform_5, window_bounds = array<i64: 128, 128>}, {pipeline_mode = #tpu.pipeline_mode<synchronous>, transform_indices = @transform_6, window_bounds = array<i64: 1, 128>}, {transform_indices = @transform_7, window_bounds = array<i64: 8, 128>}, {transform_indices = @transform_8, window_bounds = array<i64: 8, 128>}, {transform_indices = @transform_9, window_bounds = array<i64: 8, 128>}]} {
    %c0 = arith.constant 0 : index
    %c0_0 = arith.constant 0 : index
    %0 = vector.load %arg1[%c0, %c0_0] : memref<8x128xf32, #tpu.memory_space<vmem>>, vector<8x128xf32>
    %c0_1 = arith.constant 0 : index
    %c0_2 = arith.constant 0 : index
    %1 = vector.load %arg2[%c0_1, %c0_2] : memref<128x128xf32, #tpu.memory_space<vmem>>, vector<128x128xf32>
    %cst = arith.constant dense<0.000000e+00> : vector<8x128xf32>
    %2 = tpu.matmul %0, %1, %cst {dimension_numbers = #tpu.dot_dimension_numbers<[1], [0], [0], [1], [0, 0, 1, 1], [], []>} : vector<8x128xf32>, vector<128x128xf32>, vector<8x128xf32> -> vector<8x128xf32>
    %c0_3 = arith.constant 0 : index
    %c0_4 = arith.constant 0 : index
    %3 = vector.load %arg3[%c0_3, %c0_4] : memref<1x128xf32, #tpu.memory_space<vmem>>, vector<1x128xf32>
    %4 = vector.broadcast %3 : vector<1x128xf32> to vector<8x128xf32>
    %5 = arith.addf %2, %4 : vector<8x128xf32>
    %cst_5 = arith.constant 0.000000e+00 : f32
    %6 = vector.broadcast %cst_5 : f32 to vector<8x128xf32>
    %7 = arith.maximumf %5, %6 : vector<8x128xf32>
    %c0_6 = arith.constant 0 : index
    %c0_7 = arith.constant 0 : index
    %8 = vector.load %arg9[%c0_6, %c0_7] : memref<8x128xf32, #tpu.memory_space<vmem>>, vector<8x128xf32>
    tpu.vector_store %arg9[%c0_6, %c0_7], %7 {strides = array<i32>} : memref<8x128xf32, #tpu.memory_space<vmem>>, vector<8x128xf32>,
    %c0_8 = arith.constant 0 : index
    %c0_9 = arith.constant 0 : index
    %9 = vector.load %arg4[%c0_8, %c0_9] : memref<128x128xf32, #tpu.memory_space<vmem>>, vector<128x128xf32>
    %cst_10 = arith.constant dense<0.000000e+00> : vector<8x128xf32>
    %10 = tpu.matmul %7, %9, %cst_10 {dimension_numbers = #tpu.dot_dimension_numbers<[1], [0], [0], [1], [0, 0, 1, 1], [], []>} : vector<8x128xf32>, vector<128x128xf32>, vector<8x128xf32> -> vector<8x128xf32>
    %c0_11 = arith.constant 0 : index
    %c0_12 = arith.constant 0 : index
    %11 = vector.load %arg5[%c0_11, %c0_12] : memref<1x128xf32, #tpu.memory_space<vmem>>, vector<1x128xf32>
    %12 = vector.broadcast %11 : vector<1x128xf32> to vector<8x128xf32>
    %13 = arith.addf %10, %12 : vector<8x128xf32>
    %cst_13 = arith.constant 0.000000e+00 : f32
    %14 = vector.broadcast %cst_13 : f32 to vector<8x128xf32>
    %15 = arith.maximumf %13, %14 : vector<8x128xf32>
    %c0_14 = arith.constant 0 : index
    %c0_15 = arith.constant 0 : index
    %16 = vector.load %arg10[%c0_14, %c0_15] : memref<8x128xf32, #tpu.memory_space<vmem>>, vector<8x128xf32>
    tpu.vector_store %arg10[%c0_14, %c0_15], %15 {strides = array<i32>} : memref<8x128xf32, #tpu.memory_space<vmem>>, vector<8x128xf32>,
    %c0_16 = arith.constant 0 : index
    %c0_17 = arith.constant 0 : index
    %17 = vector.load %arg6[%c0_16, %c0_17] : memref<128x128xf32, #tpu.memory_space<vmem>>, vector<128x128xf32>
    %cst_18 = arith.constant dense<0.000000e+00> : vector<8x128xf32>
    %18 = tpu.matmul %15, %17, %cst_18 {dimension_numbers = #tpu.dot_dimension_numbers<[1], [0], [0], [1], [0, 0, 1, 1], [], []>} : vector<8x128xf32>, vector<128x128xf32>, vector<8x128xf32> -> vector<8x128xf32>
    %c0_19 = arith.constant 0 : index
    %c0_20 = arith.constant 0 : index
    %19 = vector.load %arg7[%c0_19, %c0_20] : memref<1x128xf32, #tpu.memory_space<vmem>>, vector<1x128xf32>
    %20 = vector.broadcast %19 : vector<1x128xf32> to vector<8x128xf32>
    %21 = arith.addf %18, %20 : vector<8x128xf32>
    %c0_21 = arith.constant 0 : index
    %c0_22 = arith.constant 0 : index
    %22 = vector.load %arg8[%c0_21, %c0_22] : memref<8x128xf32, #tpu.memory_space<vmem>>, vector<8x128xf32>
    tpu.vector_store %arg8[%c0_21, %c0_22], %21 {strides = array<i32>} : memref<8x128xf32, #tpu.memory_space<vmem>>, vector<8x128xf32>,
    return
  }
  func.func @transform_0(%arg0: i32) -> (i32, i32) {
    %c0_i32 = arith.constant 0 : i32
    %c0_i32_0 = arith.constant 0 : i32
    return %arg0, %c0_i32 : i32, i32
  }
  func.func @transform_1(%arg0: i32) -> (i32, i32) {
    %c0_i32 = arith.constant 0 : i32
    %c0_i32_0 = arith.constant 0 : i32
    %c0_i32_1 = arith.constant 0 : i32
    return %c0_i32, %c0_i32_0 : i32, i32
  }
  func.func @transform_2(%arg0: i32) -> (i32, i32) {
    %c0_i32 = arith.constant 0 : i32
    %c0_i32_0 = arith.constant 0 : i32
    %c0_i32_1 = arith.constant 0 : i32
    return %c0_i32, %c0_i32_0 : i32, i32
  }
  func.func @transform_3(%arg0: i32) -> (i32, i32) {
    %c0_i32 = arith.constant 0 : i32
    %c0_i32_0 = arith.constant 0 : i32
    %c0_i32_1 = arith.constant 0 : i32
    return %c0_i32, %c0_i32_0 : i32, i32
  }
  func.func @transform_4(%arg0: i32) -> (i32, i32) {
    %c0_i32 = arith.constant 0 : i32
    %c0_i32_0 = arith.constant 0 : i32
    %c0_i32_1 = arith.constant 0 : i32
    return %c0_i32, %c0_i32_0 : i32, i32
  }
  func.func @transform_5(%arg0: i32) -> (i32, i32) {
    %c0_i32 = arith.constant 0 : i32
    %c0_i32_0 = arith.constant 0 : i32
    %c0_i32_1 = arith.constant 0 : i32
    return %c0_i32, %c0_i32_0 : i32, i32
  }
  func.func @transform_6(%arg0: i32) -> (i32, i32) {
    %c0_i32 = arith.constant 0 : i32
    %c0_i32_0 = arith.constant 0 : i32
    %c0_i32_1 = arith.constant 0 : i32
    return %c0_i32, %c0_i32_0 : i32, i32
  }
  func.func @transform_7(%arg0: i32) -> (i32, i32) {
    %c0_i32 = arith.constant 0 : i32
    %c0_i32_0 = arith.constant 0 : i32
    return %arg0, %c0_i32 : i32, i32
  }
  func.func @transform_8(%arg0: i32) -> (i32, i32) {
    %c0_i32 = arith.constant 0 : i32
    %c0_i32_0 = arith.constant 0 : i32
    return %arg0, %c0_i32 : i32, i32
  }
  func.func @transform_9(%arg0: i32) -> (i32, i32) {
    %c0_i32 = arith.constant 0 : i32
    %c0_i32_0 = arith.constant 0 : i32
    return %arg0, %c0_i32 : i32, i32
  }
}

</mosaic_0001>

<bundles_post_ra>
// kernel: tpu_custom_call.1
= control target key start
LH: loop header
LB: loop body
LE: loop exit
PB: predicated region body
PF: predicated region fallthrough
CT: control target
= control target key end

     0   :  { %15 = vsyncpa [#allocation3], 0  ;;  %s547_s0 = inlined_call_operand.hbm [shape: f32[8,128], index: 0, kind: input, shape index: {}]   ;;  %s548_s1 = inlined_call_operand.hbm [shape: f32[128,128], index: 1, kind: input, shape index: {}]   ;;  %s549_s2 = inlined_call_operand.vmem [shape: f32[1,128], index: 2, kind: input, shape index: {}]   ;;  %s550_s3 = inlined_call_operand.hbm [shape: f32[128,128], index: 3, kind: input, shape index: {}]   ;;  %s551_s4 = inlined_call_operand.vmem [shape: f32[1,128], index: 4, kind: input, shape index: {}]   ;;  %s552_s5 = inlined_call_operand.hbm [shape: f32[128,128], index: 5, kind: input, shape index: {}]   ;;  %s553_s6 = inlined_call_operand.vmem [shape: f32[1,128], index: 6, kind: input, shape index: {}]   ;;  %s554_s7 = inlined_call_operand.hbm [shape: f32[8,128], index: 7, kind: output, shape index: {0}]   ;;  %s555_s8 = inlined_call_operand.hbm [shape: f32[8,128], index: 8, kind: output, shape index: {1}]   ;;  %s556_s9 = inlined_call_operand.hbm [shape: f32[8,128], index: 9, kind: output, shape index: {2}]  }
   0x1   :  { %16 = vsyncpa [#allocation6], 0 }
   0x2   :  { %17 = vsyncpa [#allocation9], 0 }
   0x3   :  { %18 = vsyncpa [#allocation4], 0  ;;  %s35_s11 = sshll.u32 %s548_s1, 4  ;;  %s36_s11 = int_to_ptr.hbm [resolvable:$true] %s35_s11 }
   0x4   :  { %19 = vsyncpa [#allocation12], 0  ;;  %s458_s12 = smov [#allocation5]   ;;  %s25_s16 = sshll.u32 %s547_s0, 4  ;;  %s26_s16 = int_to_ptr.hbm [resolvable:$true] %s25_s16 }
   0x5   :  { %s37_s13 = sshll.u32 %s458_s12, 4  ;;  %s459_s17 = smov 128   ;;  %s38_s13 = int_to_ptr.vmem [resolvable:$true] %s37_s13 }
   0x6   :  { %s460_s18 = smov 8   ;;  %s461_s19 = smov [#allocation2]  }
   0x7   :  { %43 = dma.hbm_to_vmem [thread:$0]  %s36_s11, 2048, %s38_s13, [#allocation6], %s459_s17, %s459_s17, %s460_s18  }
   0x8   :  { %s27_s20 = sshll.u32 %s461_s19, 4  ;;  %s50_s23 = sshll.u32 %s550_s3, 4  ;;  %s28_s20 = int_to_ptr.vmem [resolvable:$true] %s27_s20  ;;  %s51_s23 = int_to_ptr.hbm [resolvable:$true] %s50_s23 }
   0x9   :  { %30 = dma.hbm_to_vmem [thread:$0]  %s26_s16, 128, %s28_s20, [#allocation3]  }
   0xa   :  { %s65_s25 = sshll.u32 %s552_s5, 4  ;;  %s462_s26 = smov [#allocation7]   ;;  %s66_s25 = int_to_ptr.hbm [resolvable:$true] %s65_s25 }
   0xb   :  { %s52_s27 = sshll.u32 %s462_s26, 4  ;;  %s463_s0 = smov [#allocation8]   ;;  %s53_s27 = int_to_ptr.vmem [resolvable:$true] %s52_s27 }
   0xc   :  { %58 = dma.hbm_to_vmem [thread:$0]  %s51_s23, 2048, %s53_s27, [#allocation6], %s459_s17, %s459_s17, %s460_s18  }
   0xd   :  { %s67_s28 = sshll.u32 %s463_s0, 4  ;;  %s68_s28 = int_to_ptr.vmem [resolvable:$true] %s67_s28 }
   0xe   :  { %73 = dma.hbm_to_vmem [thread:$0]  %s66_s25, 2048, %s68_s28, [#allocation9], %s459_s17, %s459_s17, %s460_s18  }
   0xf   :  { %448 = dma.done.wait [#allocation3], 128  }
  0x10   :  { %449 = vsyncadd [#allocation3], 4294967168 }
  0x11   :  { %450 = dma.done.wait [#allocation6], 4096  }
  0x12   :  { %451 = vsyncadd [#allocation6], 4294963200 }
  0x13   :  { %452 = dma.done.wait [#allocation9], 2048  }
  0x14   :  { %453 = vsyncadd [#allocation9], 4294965248  ;;  %v108_v0 = vld [vmem:[#allocation5 + $0x78] sm:$0xff]  ;;  %v107_v1 = vld [vmem:[#allocation5 + $0x70] sm:$0xff]  ;;  %s236_s13 = sshll.u32 %s555_s8, 4  ;;  %s465_s14 = smov [#allocation13]   ;;  %s237_s13 = int_to_ptr.hbm [resolvable:$true] %s236_s13 }
  0x15   :  { %113 = vmatpush.msra.mxu0 %v108_v0  ;;  %v106_v2 = vld [vmem:[#allocation5 + $0x68] sm:$0xff]  ;;  %v105_v3 = vld [vmem:[#allocation5 + $0x60] sm:$0xff]  ;;  %v150_v4 = vld [vmem:[#allocation7 + $0x78] sm:$0xff]  ;;  %s245_s15 = sshll.u32 %s465_s14, 4  ;;  %s466_s20 = smov [#allocation10]   ;;  %s246_s15 = int_to_ptr.vmem [resolvable:$true] %s245_s15 }
  0x16   :  { %v104_v5 = vld [vmem:[#allocation5 + $0x58] sm:$0xff]  ;;  %155 = vmatpush.msra.mxu1 %v150_v4  ;;  %v149_v6 = vld [vmem:[#allocation7 + $0x70] sm:$0xff]  ;;  %v148_v7 = vld [vmem:[#allocation7 + $0x68] sm:$0xff]  ;;  %s223_s21 = sshll.u32 %s466_s20, 4  ;;  %s225_s23 = sshll.u32 %s554_s7, 4  ;;  %s224_s21 = int_to_ptr.vmem [resolvable:$true] %s223_s21  ;;  %s226_s23 = int_to_ptr.hbm [resolvable:$true] %s225_s23 }
  0x17   :  { %114 = vmatpush.msra.mxu0 %v107_v1  ;;  %v103_v8 = vld [vmem:[#allocation5 + $0x50] sm:$0xff]  ;;  %v147_v9 = vld [vmem:[#allocation7 + $0x60] sm:$0xff]  ;;  %v102_v10 = vld [vmem:[#allocation5 + $0x48] sm:$0xff] }
  0x18   :  { %156 = vmatpush.msra.mxu1 %v149_v6  ;;  %v146_v11 = vld [vmem:[#allocation7 + $0x58] sm:$0xff]  ;;  %v101_v12 = vld [vmem:[#allocation5 + $0x40] sm:$0xff]  ;;  %v145_v13 = vld [vmem:[#allocation7 + $0x50] sm:$0xff] }
  0x19   :  { %115 = vmatpush.msra.mxu0 %v106_v2  ;;  %v100_v14 = vld [vmem:[#allocation5 + $0x38] sm:$0xff]  ;;  %v144_v15 = vld [vmem:[#allocation7 + $0x48] sm:$0xff]  ;;  %v99_v16 = vld [vmem:[#allocation5 + $0x30] sm:$0xff] }
  0x1a   :  { %157 = vmatpush.msra.mxu1 %v148_v7  ;;  %v143_v17 = vld [vmem:[#allocation7 + $0x40] sm:$0xff]  ;;  %v98_v18 = vld [vmem:[#allocation5 + $0x28] sm:$0xff]  ;;  %v142_v19 = vld [vmem:[#allocation7 + $0x38] sm:$0xff] }
  0x1b   :  { %116 = vmatpush.msra.mxu0 %v105_v3  ;;  %v97_v20 = vld [vmem:[#allocation5 + $0x20] sm:$0xff]  ;;  %v141_v21 = vld [vmem:[#allocation7 + $0x30] sm:$0xff]  ;;  %v96_v22 = vld [vmem:[#allocation5 + $0x18] sm:$0xff] }
  0x1c   :  { %158 = vmatpush.msra.mxu1 %v147_v9  ;;  %v140_v23 = vld [vmem:[#allocation7 + $0x28] sm:$0xff]  ;;  %v95_v24 = vld [vmem:[#allocation5 + $0x10] sm:$0xff]  ;;  %v139_v25 = vld [vmem:[#allocation7 + $0x20] sm:$0xff] }
  0x1d   :  { %117 = vmatpush.msra.mxu0 %v104_v5  ;;  %v94_v26 = vld [vmem:[#allocation5 + $0x8] sm:$0xff]  ;;  %v138_v27 = vld [vmem:[#allocation7 + $0x18] sm:$0xff]  ;;  %v93_v28 = vld [vmem:[#allocation5] sm:$0xff] }
  0x1e   :  { %159 = vmatpush.msra.mxu1 %v146_v11  ;;  %v92_v29 = vld [vmem:[#allocation2] sm:$0xff]  ;;  %v137_v30 = vld [vmem:[#allocation7 + $0x10] sm:$0xff]  ;;  %v136_v31 = vld [vmem:[#allocation7 + $0x8] sm:$0xff] }
  0x1f   :  { %118 = vmatpush.msra.mxu0 %v103_v8  ;;  %v135_v32 = vld [vmem:[#allocation7] sm:$0xff]  ;;  %v192_v33 = vld [vmem:[#allocation8 + $0x78] sm:$0xff]  ;;  %v191_v34 = vld [vmem:[#allocation8 + $0x70] sm:$0xff] }
  0x20   :  { %160 = vmatpush.msra.mxu1 %v145_v13  ;;  %197 = vmatpush.msra.mxu2 %v192_v33  ;;  %v190_v35 = vld [vmem:[#allocation8 + $0x68] sm:$0xff]  ;;  %v189_v36 = vld [vmem:[#allocation8 + $0x60] sm:$0xff]  ;;  %v188_v37 = vld [vmem:[#allocation8 + $0x58] sm:$0xff] }
  0x21   :  { %119 = vmatpush.msra.mxu0 %v102_v10  ;;  %v187_v38 = vld [vmem:[#allocation8 + $0x50] sm:$0xff]  ;;  %v186_v39 = vld [vmem:[#allocation8 + $0x48] sm:$0xff]  ;;  %v185_v40 = vld [vmem:[#allocation8 + $0x40] sm:$0xff] }
  0x22   :  { %161 = vmatpush.msra.mxu1 %v144_v15  ;;  %198 = vmatpush.msra.mxu2 %v191_v34  ;;  %v184_v41 = vld [vmem:[#allocation8 + $0x38] sm:$0xff]  ;;  %v183_v42 = vld [vmem:[#allocation8 + $0x30] sm:$0xff]  ;;  %v182_v43 = vld [vmem:[#allocation8 + $0x28] sm:$0xff] }
  0x23   :  { %120 = vmatpush.msra.mxu0 %v101_v12  ;;  %v181_v44 = vld [vmem:[#allocation8 + $0x20] sm:$0xff]  ;;  %v180_v45 = vld [vmem:[#allocation8 + $0x18] sm:$0xff]  ;;  %v179_v50 = vld [vmem:[#allocation8 + $0x10] sm:$0xff] }
  0x24   :  { %162 = vmatpush.msra.mxu1 %v143_v17  ;;  %199 = vmatpush.msra.mxu2 %v190_v35  ;;  %v277_v46 = vld [vmem:[%s549_s2] ss:$0 sm:$0xff]  ;;  %v178_v51 = vld [vmem:[#allocation8 + $0x8] sm:$0xff]  ;;  %v177_v52 = vld [vmem:[#allocation8] sm:$0xff]  ;;  %s464_s2 = smov [#allocation11]  }
  0x25   :  { %121 = vmatpush.msra.mxu0 %v100_v14  ;;  %v278_v53 = vld [vmem:[%s551_s4] ss:$0 sm:$0xff]  ;;  %s234_s10 = sshll.u32 %s464_s2, 4  ;;  %s247_s4 = sshll.u32 %s556_s9, 4  ;;  %s235_s10 = int_to_ptr.vmem [resolvable:$true] %s234_s10  ;;  %s248_s4 = int_to_ptr.hbm [resolvable:$true] %s247_s4 }
  0x26   :  { %163 = vmatpush.msra.mxu1 %v142_v19  ;;  %200 = vmatpush.msra.mxu2 %v189_v36  ;;  %v279_v57 = vld [vmem:[%s553_s6] ss:$0 sm:$0xff] }
  0x27   :  { %122 = vmatpush.msra.mxu0 %v99_v16 }
  0x28   :  { %164 = vmatpush.msra.mxu1 %v141_v21  ;;  %201 = vmatpush.msra.mxu2 %v188_v37 }
  0x29   :  { %123 = vmatpush.msra.mxu0 %v98_v18 }
  0x2a   :  { %165 = vmatpush.msra.mxu1 %v140_v23  ;;  %202 = vmatpush.msra.mxu2 %v187_v38 }
  0x2b   :  { %124 = vmatpush.msra.mxu0 %v97_v20 }
  0x2c   :  { %166 = vmatpush.msra.mxu1 %v139_v25  ;;  %203 = vmatpush.msra.mxu2 %v186_v39 }
  0x2d   :  { %125 = vmatpush.msra.mxu0 %v96_v22 }
  0x2e   :  { %167 = vmatpush.msra.mxu1 %v138_v27  ;;  %204 = vmatpush.msra.mxu2 %v185_v40 }
  0x2f   :  { %126 = vmatpush.msra.mxu0 %v95_v24 }
  0x30   :  { %168 = vmatpush.msra.mxu1 %v137_v30  ;;  %205 = vmatpush.msra.mxu2 %v184_v41 }
  0x31   :  { %127 = vmatpush.msra.mxu0 %v94_v26 }
  0x32   :  { %169 = vmatpush.msra.mxu1 %v136_v31  ;;  %206 = vmatpush.msra.mxu2 %v183_v42 }
  0x33   :  { %128 = vmatpush.msra.mxu0 %v93_v28 }
  0x34   :  { %129 = vmatmul.f32.vlgmr.msra.gmra.mxu0 %v92_v29  ;;  %170 = vmatpush.msra.mxu1 %v135_v32 }
  0x35   :  { %207 = vmatpush.msra.mxu2 %v182_v43 }
  0x37   :  { %208 = vmatpush.msra.mxu2 %v181_v44 }
  0x39   :  { %209 = vmatpush.msra.mxu2 %v180_v45 }
  0x3b   :  { %210 = vmatpush.msra.mxu2 %v179_v50 }
  0x3d   :  { %211 = vmatpush.msra.mxu2 %v178_v51 }
  0x3f   :  { %212 = vmatpush.msra.mxu2 %v177_v52 }
  0xb1   :  { %v130_v47 = vpop.f32.mrf.mxu0 }
  0xb2   :  { %v131_v48 = vadd.f32 %v277_v46, %v130_v47 }
  0xb4   :  { %v133_v49 = vmax.f32 %v131_v48, 0.0 }
  0xb6   :  { %134 = vst [vmem:[#allocation11] sm:$0xff] %v133_v49  ;;  %171 = vmatmul.f32.vlgmr.msra.gmra.mxu1 %v133_v49 }
  0xb7   :  { %239 = dma.vmem_to_hbm [thread:$0]  %s235_s10, 128, %s237_s13, [#allocation12]  }
 0x133   :  { %v172_v54 = vpop.f32.mrf.mxu1 }
 0x134   :  { %v173_v55 = vadd.f32 %v278_v53, %v172_v54 }
 0x136   :  { %v175_v56 = vmax.f32 %v173_v55, 0.0 }
 0x138   :  { %176 = vst [vmem:[#allocation13] sm:$0xff] %v175_v56  ;;  %213 = vmatmul.f32.vlgmr.msra.gmra.mxu2 %v175_v56 }
 0x139   :  { %250 = dma.vmem_to_hbm [thread:$0]  %s246_s15, 128, %s248_s4, [#allocation12]  }
 0x1bb   :  { %v214_v58 = vpop.f32.mrf.mxu2 }
 0x1bc   :  { %v215_v59 = vadd.f32 %v279_v57, %v214_v58 }
 0x1be   :  { %217 = vst [vmem:[#allocation10] sm:$0xff] %v215_v59 }
 0x1bf   :  { %228 = dma.vmem_to_hbm [thread:$0]  %s224_s21, 128, %s226_s23, [#allocation4]  }
 0x1c0   :  { %454 = dma.done.wait [#allocation4], 128  }
 0x1c1   :  { %455 = vsyncadd [#allocation4], 4294967168 }
 0x1c2   :  { %456 = dma.done.wait [#allocation12], 256  }
 0x1c3   :  { %457 = vsyncadd [#allocation12], 4294967040 }
 0x1c4   :  { %263 = vsyncpa [#allocation3], 1 }
 0x1c5   :  { %264 = vsyncpa [#allocation6], 1 }
 0x1c6   :  { %265 = vsyncpa [#allocation9], 1 }
 0x1c7   :  { %266 = vsyncpa [#allocation4], 1 }
 0x1c8   :  { %267 = vsyncpa [#allocation12], 1 }

</bundles_post_ra>
